<compile_context>
chip_gen: v5e
topology: v5e:2x2
jax: 0.10.0
libtpu: 0.0.40
codegen_flags: <defaults>
</compile_context>

<pallas_src>
import functools

import jax
import jax.numpy as jnp
from jax.experimental import pallas as pl
from jax.experimental.pallas import tpu as pltpu


def _decision_kernel(x_ref, w1_ref, b1_ref, w2_ref, b2_ref, o_ref):
    # x_ref:  (block_b, 128) f32      batch tile, features on lanes
    # w1_ref: (128, 32)               Linear(128, 32) weight, stored (in, out)
    # b1_ref: (1, 32)
    # w2_ref: (32, 1)                 Linear(32, 1) weight, stored (in, out)
    # b2_ref: (1,) in SMEM            Linear(32, 1) bias (scalar)
    # o_ref:  (block_b // 128, 128)   lane-dense output: row r, lane j <-> batch r*128 + j
    w1 = w1_ref[...]
    b1 = b1_ref[...]
    w2c = w2_ref[...]              # (32, 1) column, broadcasts along lanes
    b2 = b2_ref[0]

    n_rows = o_ref.shape[0]        # static
    parts = []
    for r in range(n_rows):        # static, unrolled; 128 batch rows per iteration
        x_r = x_ref[pl.ds(r * 128, 128), :]                        # (128, 128)
        h_r = jnp.dot(x_r, w1, preferred_element_type=jnp.float32) + b1
        h_r = jnp.maximum(h_r, 0.0)                                # ReLU, (128, 32)
        # Linear(32 -> 1) as multiply + sublane reduce on the small transposed tile
        # so the 128 batch elements land on lanes (keeps MXU free of N=1 matmuls).
        y_r = jnp.sum(h_r.T * w2c, axis=0, keepdims=True)          # (1, 128)
        parts.append(y_r)
    y = jnp.concatenate(parts, axis=0) if n_rows > 1 else parts[0]  # (n_rows, 128)
    y = y + b2
    o_ref[...] = (1.0 / (1.0 + jnp.exp(-y))).astype(o_ref.dtype)    # Sigmoid


def siamese_decision_net(vector, w1, b1, w2, b2, *, block_b=1024):
    """vector: (B, 128) float32 -> (B, 1), matching SiameseDecisionNet.forward.

    Weights are stored (in, out): w1 (128, 32), b1 (32,), w2 (32, 1), b2 (1,)
    (PyTorch's (out, in) Linear weights transposed once, outside the kernel).
    """
    B, D = vector.shape
    assert D == 128, "SiameseDecisionNet expects 128 input features"

    # Tile size: multiple of 1024 so the lane-dense output block is (>=8, 128).
    block_b = max(1024, ((block_b + 1023) // 1024) * 1024)

    if B >= block_b:
        # Large batch: stream full tiles; Pallas handles the ragged last block.
        # No wrapper jnp.pad (it would add a full extra HBM copy of x).
        x = vector
        bb = block_b
        grid = pl.cdiv(B, bb)
    else:
        # Small batch: single tile covering the batch, padded to a multiple of
        # 128 rows (at most 127 junk rows, negligible bytes).
        bb = max(128, ((B + 127) // 128) * 128)
        pad = bb - B
        x = jnp.pad(vector, ((0, pad), (0, 0))) if pad else vector
        grid = 1

    rows = bb // 128

    out2d = pl.pallas_call(
        _decision_kernel,
        out_shape=jax.ShapeDtypeStruct((grid * rows, 128), vector.dtype),
        grid_spec=pltpu.PrefetchScalarGridSpec(
            num_scalar_prefetch=0,
            grid=(grid,),
            in_specs=[
                pl.BlockSpec((bb, 128), lambda i: (i, 0)),            # x tile (streams)
                pl.BlockSpec((128, 32), lambda i: (0, 0)),            # W1 (resident)
                pl.BlockSpec((1, 32), lambda i: (0, 0)),              # b1
                pl.BlockSpec((32, 1), lambda i: (0, 0)),              # W2
                pl.BlockSpec(memory_space=pltpu.MemorySpace.SMEM),    # b2 scalar
            ],
            out_specs=pl.BlockSpec((rows, 128), lambda i: (i, 0)),
        ),
        compiler_params=pltpu.CompilerParams(
            dimension_semantics=("parallel",),
        ),
    )(x, w1, b1.reshape(1, 32), w2, b2.reshape(1))

    # Row-major flatten of (grid*rows, 128) matches batch order; reshape is free.
    return out2d.reshape(-1)[:B].reshape(B, 1)


def init_params(key):
    """Deterministic synthetic parameters matching nn.Linear shapes."""
    k1, k2, k3, k4 = jax.random.split(key, 4)
    # PyTorch Linear stores (out, in); we store transposed (in, out) for x @ W.
    bound1 = 1.0 / jnp.sqrt(128.0)
    w1 = jax.random.uniform(k1, (128, 32), jnp.float32, -bound1, bound1)
    b1 = jax.random.uniform(k2, (32,), jnp.float32, -bound1, bound1)
    bound2 = 1.0 / jnp.sqrt(32.0)
    w2 = jax.random.uniform(k3, (32, 1), jnp.float32, -bound2, bound2)
    b2 = jax.random.uniform(k4, (1,), jnp.float32, -bound2, bound2)
    return w1, b1, w2, b2


def reference(vector, w1, b1, w2, b2):
    h = jnp.maximum(vector @ w1 + b1, 0.0)
    return jax.nn.sigmoid(h @ w2 + b2)


if __name__ == "__main__":
    key = jax.random.PRNGKey(0)
    k_x, k_p = jax.random.split(key)
    w1, b1, w2, b2 = init_params(k_p)

    fn = jax.jit(functools.partial(siamese_decision_net, block_b=1024))

    # Small batch (single-tile path).
    B_small = 8
    x_small = jax.random.normal(k_x, (B_small, 128), jnp.float32)
    out_small = jax.block_until_ready(fn(x_small, w1, b1, w2, b2))
    ref_small = reference(x_small, w1, b1, w2, b2)
    assert out_small.shape == (B_small, 1), out_small.shape
    assert jnp.allclose(out_small, ref_small, atol=1e-5, rtol=1e-5), "small-batch mismatch"

    # Multi-tile batch (streaming, lane-dense output path).
    B_big = 2048
    x_big = jax.random.normal(k_x, (B_big, 128), jnp.float32)
    out_big = jax.block_until_ready(fn(x_big, w1, b1, w2, b2))
    ref_big = reference(x_big, w1, b1, w2, b2)
    assert out_big.shape == (B_big, 1), out_big.shape
    assert jnp.allclose(out_big, ref_big, atol=1e-5, rtol=1e-5), "multi-tile mismatch"

    print("KERNEL_OK")
</pallas_src>

<mosaic_0001>
module attributes {stable_mosaic.version = 11 : i64} {
  func.func @_decision_kernel(%arg0: i32, %arg1: memref<128x128xf32, #tpu.memory_space<vmem>>, %arg2: memref<128x32xf32, #tpu.memory_space<vmem>>, %arg3: memref<1x32xf32, #tpu.memory_space<vmem>>, %arg4: memref<32x1xf32, #tpu.memory_space<vmem>>, %arg5: memref<1xf32, #tpu.memory_space<smem>>, %arg6: memref<1x128xf32, #tpu.memory_space<vmem>>) attributes {dimension_semantics = [#tpu.dimension_semantics<parallel>], iteration_bounds = array<i64: 1>, scalar_prefetch = 0 : i64, scratch_operands = 0 : i64, tpu.core_type = #tpu.core_type<tc>, window_params = [{transform_indices = @transform_0, window_bounds = array<i64: 128, 128>}, {pipeline_mode = #tpu.pipeline_mode<synchronous>, transform_indices = @transform_1, window_bounds = array<i64: 128, 32>}, {pipeline_mode = #tpu.pipeline_mode<synchronous>, transform_indices = @transform_2, window_bounds = array<i64: 1, 32>}, {pipeline_mode = #tpu.pipeline_mode<synchronous>, transform_indices = @transform_3, window_bounds = array<i64: 32, 1>}, {transform_indices = @transform_4, window_bounds = array<i64: 1>}, {transform_indices = @transform_5, window_bounds = array<i64: 1, 128>}]} {
    %c0 = arith.constant 0 : index
    %c0_0 = arith.constant 0 : index
    %0 = vector.load %arg2[%c0, %c0_0] : memref<128x32xf32, #tpu.memory_space<vmem>>, vector<128x32xf32>
    %c0_1 = arith.constant 0 : index
    %c0_2 = arith.constant 0 : index
    %1 = vector.load %arg3[%c0_1, %c0_2] : memref<1x32xf32, #tpu.memory_space<vmem>>, vector<1x32xf32>
    %c0_3 = arith.constant 0 : index
    %c0_4 = arith.constant 0 : index
    %2 = vector.load %arg4[%c0_3, %c0_4] : memref<32x1xf32, #tpu.memory_space<vmem>>, vector<32x1xf32>
    %c0_5 = arith.constant 0 : index
    %3 = memref.load %arg5[%c0_5] : memref<1xf32, #tpu.memory_space<smem>>
    %c0_6 = arith.constant 0 : index
    %c0_7 = arith.constant 0 : index
    %4 = vector.load %arg1[%c0_6, %c0_7] : memref<128x128xf32, #tpu.memory_space<vmem>>, vector<128x128xf32>
    %cst = arith.constant dense<0.000000e+00> : vector<128x32xf32>
    %5 = tpu.matmul %4, %0, %cst {dimension_numbers = #tpu.dot_dimension_numbers<[1], [0], [0], [1], [0, 0, 1, 1], [], []>} : vector<128x128xf32>, vector<128x32xf32>, vector<128x32xf32> -> vector<128x32xf32>
    %6 = vector.broadcast %1 : vector<1x32xf32> to vector<128x32xf32>
    %7 = arith.addf %5, %6 : vector<128x32xf32>
    %cst_8 = arith.constant 0.000000e+00 : f32
    %8 = vector.broadcast %cst_8 : f32 to vector<128x32xf32>
    %9 = arith.maximumf %7, %8 : vector<128x32xf32>
    %10 = tpu.transpose %9, [1, 0] : vector<128x32xf32> -> vector<32x128xf32>
    %11 = vector.broadcast %2 : vector<32x1xf32> to vector<32x128xf32>
    %12 = arith.mulf %10, %11 : vector<32x128xf32>
    %cst_9 = arith.constant dense<0.000000e+00> : vector<128xf32>
    %13 = vector.multi_reduction <add>, %12, %cst_9 [0] : vector<32x128xf32> to vector<128xf32>
    %14 = vector.shape_cast %13 : vector<128xf32> to vector<1x128xf32>
    %15 = vector.broadcast %3 : f32 to vector<1x128xf32>
    %16 = arith.addf %14, %15 : vector<1x128xf32>
    %cst_10 = arith.constant 0.000000e+00 : f32
    %17 = vector.broadcast %cst_10 : f32 to vector<1x128xf32>
    %18 = arith.subf %17, %16 : vector<1x128xf32>
    %19 = math.exp %18 : vector<1x128xf32>
    %cst_11 = arith.constant 1.000000e+00 : f32
    %20 = vector.broadcast %cst_11 : f32 to vector<1x128xf32>
    %21 = arith.addf %20, %19 : vector<1x128xf32>
    %cst_12 = arith.constant 1.000000e+00 : f32
    %22 = vector.broadcast %cst_12 : f32 to vector<1x128xf32>
    %23 = arith.divf %22, %21 : vector<1x128xf32>
    %c0_13 = arith.constant 0 : index
    %c0_14 = arith.constant 0 : index
    %24 = vector.load %arg6[%c0_13, %c0_14] : memref<1x128xf32, #tpu.memory_space<vmem>>, vector<1x128xf32>
    tpu.vector_store %arg6[%c0_13, %c0_14], %23 {strides = array<i32>} : memref<1x128xf32, #tpu.memory_space<vmem>>, vector<1x128xf32>,
    return
  }
  func.func @transform_0(%arg0: i32) -> (i32, i32) {
    %c0_i32 = arith.constant 0 : i32
    %c0_i32_0 = arith.constant 0 : i32
    return %arg0, %c0_i32 : i32, i32
  }
  func.func @transform_1(%arg0: i32) -> (i32, i32) {
    %c0_i32 = arith.constant 0 : i32
    %c0_i32_0 = arith.constant 0 : i32
    %c0_i32_1 = arith.constant 0 : i32
    return %c0_i32, %c0_i32_0 : i32, i32
  }
  func.func @transform_2(%arg0: i32) -> (i32, i32) {
    %c0_i32 = arith.constant 0 : i32
    %c0_i32_0 = arith.constant 0 : i32
    %c0_i32_1 = arith.constant 0 : i32
    return %c0_i32, %c0_i32_0 : i32, i32
  }
  func.func @transform_3(%arg0: i32) -> (i32, i32) {
    %c0_i32 = arith.constant 0 : i32
    %c0_i32_0 = arith.constant 0 : i32
    %c0_i32_1 = arith.constant 0 : i32
    return %c0_i32, %c0_i32_0 : i32, i32
  }
  func.func @transform_4(%arg0: i32) -> i32 {
    %c0_i32 = arith.constant 0 : i32
    %c0_i32_0 = arith.constant 0 : i32
    return %c0_i32 : i32
  }
  func.func @transform_5(%arg0: i32) -> (i32, i32) {
    %c0_i32 = arith.constant 0 : i32
    %c0_i32_0 = arith.constant 0 : i32
    return %arg0, %c0_i32 : i32, i32
  }
}

</mosaic_0001>

<bundles_post_ra>
// kernel: siamese_decision_net.1
= control target key start
LH: loop header
LB: loop body
LE: loop exit
PB: predicated region body
PF: predicated region fallthrough
CT: control target
= control target key end

     0   :  { %v291_v44 = vmov 0   ;;  %s460_s1 = inlined_call_operand.vmem [shape: f32[128,32], index: 1, kind: input, shape index: {}]   ;;  %s461_s0 = inlined_call_operand.vmem [shape: f32[128,128], index: 0, kind: input, shape index: {}]   ;;  %s462_s2 = inlined_call_operand.vmem [shape: f32[1,32], index: 2, kind: input, shape index: {}]   ;;  %s463_s3 = inlined_call_operand.vmem [shape: f32[32,1], index: 3, kind: input, shape index: {}]   ;;  %s464_s4 = inlined_call_operand.<no memory space> [shape: f32[1], index: 4, kind: input, shape index: {}]   ;;  %s465_s5 = inlined_call_operand.vmem [shape: f32[1,128], index: 5, kind: output, shape index: {}]  }
   0x1   :  { %v36_v0 = vld [vmem:[%s460_s1 + $0x78] sm:$0xff]  ;;  %v35_v1 = vld [vmem:[%s460_s1 + $0x70] sm:$0xff]  ;;  %v34_v2 = vld [vmem:[%s460_s1 + $0x68] sm:$0xff]  ;;  %283 = vset.pattern.permute.xlu1 %v291_v44  ;;  %284 = vset.pattern.permute.xlu2 %v291_v44 }
   0x2   :  { %62 = vmatpush.msra.mxu0 %v36_v0  ;;  %234 = vmatpush.msra.mxu1 %v36_v0  ;;  %v33_v3 = vld [vmem:[%s460_s1 + $0x60] sm:$0xff]  ;;  %v32_v4 = vld [vmem:[%s460_s1 + $0x58] sm:$0xff]  ;;  %v31_v5 = vld [vmem:[%s460_s1 + $0x50] sm:$0xff] }
   0x3   :  { %235 = vmatpush.msra.mxu2 %v36_v0  ;;  %236 = vmatpush.msra.mxu3 %v36_v0  ;;  %v30_v6 = vld [vmem:[%s460_s1 + $0x48] sm:$0xff]  ;;  %v29_v7 = vld [vmem:[%s460_s1 + $0x40] sm:$0xff]  ;;  %v28_v8 = vld [vmem:[%s460_s1 + $0x38] sm:$0xff] }
   0x4   :  { %63 = vmatpush.msra.mxu0 %v35_v1  ;;  %237 = vmatpush.msra.mxu1 %v35_v1  ;;  %v27_v9 = vld [vmem:[%s460_s1 + $0x30] sm:$0xff]  ;;  %v26_v10 = vld [vmem:[%s460_s1 + $0x28] sm:$0xff]  ;;  %v25_v11 = vld [vmem:[%s460_s1 + $0x20] sm:$0xff] }
   0x5   :  { %238 = vmatpush.msra.mxu2 %v35_v1  ;;  %239 = vmatpush.msra.mxu3 %v35_v1  ;;  %v24_v12 = vld [vmem:[%s460_s1 + $0x18] sm:$0xff]  ;;  %v23_v13 = vld [vmem:[%s460_s1 + $0x10] sm:$0xff]  ;;  %v22_v14 = vld [vmem:[%s460_s1 + $0x8] sm:$0xff] }
   0x6   :  { %64 = vmatpush.msra.mxu0 %v34_v2  ;;  %240 = vmatpush.msra.mxu1 %v34_v2  ;;  %v21_v15 = vld [vmem:[%s460_s1] sm:$0xff]  ;;  %v44_v20 = vld [vmem:[%s461_s0 + $0x8] sm:$0xff]  ;;  %v45_v24 = vld [vmem:[%s461_s0 + $0x10] sm:$0xff] }
   0x7   :  { %241 = vmatpush.msra.mxu2 %v34_v2  ;;  %242 = vmatpush.msra.mxu3 %v34_v2  ;;  %v43_v16 = vld [vmem:[%s461_s0] sm:$0xff]  ;;  %v48_v21 = vld [vmem:[%s461_s0 + $0x28] sm:$0xff]  ;;  %v49_v25 = vld [vmem:[%s461_s0 + $0x30] sm:$0xff] }
   0x8   :  { %65 = vmatpush.msra.mxu0 %v33_v3  ;;  %243 = vmatpush.msra.mxu1 %v33_v3  ;;  %v47_v17 = vld [vmem:[%s461_s0 + $0x20] sm:$0xff]  ;;  %v52_v22 = vld [vmem:[%s461_s0 + $0x48] sm:$0xff]  ;;  %v53_v26 = vld [vmem:[%s461_s0 + $0x50] sm:$0xff] }
   0x9   :  { %244 = vmatpush.msra.mxu2 %v33_v3  ;;  %245 = vmatpush.msra.mxu3 %v33_v3  ;;  %v51_v18 = vld [vmem:[%s461_s0 + $0x40] sm:$0xff]  ;;  %v56_v23 = vld [vmem:[%s461_s0 + $0x68] sm:$0xff]  ;;  %v57_v27 = vld [vmem:[%s461_s0 + $0x70] sm:$0xff] }
   0xa   :  { %66 = vmatpush.msra.mxu0 %v32_v4  ;;  %246 = vmatpush.msra.mxu1 %v32_v4  ;;  %v55_v19 = vld [vmem:[%s461_s0 + $0x60] sm:$0xff]  ;;  %v46_v28 = vld [vmem:[%s461_s0 + $0x18] sm:$0xff]  ;;  %v39_v49 = vld [vmem:[%s463_s3 + $0x8] sm:$0xff] }
   0xb   :  { %247 = vmatpush.msra.mxu2 %v32_v4  ;;  %248 = vmatpush.msra.mxu3 %v32_v4  ;;  %v50_v29 = vld [vmem:[%s461_s0 + $0x38] sm:$0xff]  ;;  %v421_v32 = vld [vmem:[%s462_s2] ss:$0 sm:$0xff]  ;;  %v40_v60 = vld [vmem:[%s463_s3 + $0x10] sm:$0xff] }
   0xc   :  { %67 = vmatpush.msra.mxu0 %v31_v5  ;;  %249 = vmatpush.msra.mxu1 %v31_v5  ;;  %v54_v30 = vld [vmem:[%s461_s0 + $0x58] sm:$0xff]  ;;  %v38_v43 = vld [vmem:[%s463_s3] sm:$0xff] }
   0xd   :  { %250 = vmatpush.msra.mxu2 %v31_v5  ;;  %251 = vmatpush.msra.mxu3 %v31_v5  ;;  %v58_v31 = vld [vmem:[%s461_s0 + $0x78] sm:$0xff] }
   0xe   :  { %68 = vmatpush.msra.mxu0 %v30_v6  ;;  %252 = vmatpush.msra.mxu1 %v30_v6  ;;  %v41_v63 = vld [vmem:[%s463_s3 + $0x18] sm:$0xff] }
   0xf   :  { %253 = vmatpush.msra.mxu2 %v30_v6  ;;  %254 = vmatpush.msra.mxu3 %v30_v6 }
  0x10   :  { %69 = vmatpush.msra.mxu0 %v29_v7  ;;  %255 = vmatpush.msra.mxu1 %v29_v7 }
  0x11   :  { %256 = vmatpush.msra.mxu2 %v29_v7  ;;  %257 = vmatpush.msra.mxu3 %v29_v7 }
  0x12   :  { %70 = vmatpush.msra.mxu0 %v28_v8  ;;  %258 = vmatpush.msra.mxu1 %v28_v8 }
  0x13   :  { %259 = vmatpush.msra.mxu2 %v28_v8  ;;  %260 = vmatpush.msra.mxu3 %v28_v8 }
  0x14   :  { %71 = vmatpush.msra.mxu0 %v27_v9  ;;  %261 = vmatpush.msra.mxu1 %v27_v9 }
  0x15   :  { %262 = vmatpush.msra.mxu2 %v27_v9  ;;  %263 = vmatpush.msra.mxu3 %v27_v9 }
  0x16   :  { %72 = vmatpush.msra.mxu0 %v26_v10  ;;  %264 = vmatpush.msra.mxu1 %v26_v10 }
  0x17   :  { %265 = vmatpush.msra.mxu2 %v26_v10  ;;  %266 = vmatpush.msra.mxu3 %v26_v10 }
  0x18   :  { %73 = vmatpush.msra.mxu0 %v25_v11  ;;  %267 = vmatpush.msra.mxu1 %v25_v11 }
  0x19   :  { %268 = vmatpush.msra.mxu2 %v25_v11  ;;  %269 = vmatpush.msra.mxu3 %v25_v11 }
  0x1a   :  { %74 = vmatpush.msra.mxu0 %v24_v12  ;;  %270 = vmatpush.msra.mxu1 %v24_v12 }
  0x1b   :  { %271 = vmatpush.msra.mxu2 %v24_v12  ;;  %272 = vmatpush.msra.mxu3 %v24_v12 }
  0x1c   :  { %75 = vmatpush.msra.mxu0 %v23_v13  ;;  %273 = vmatpush.msra.mxu1 %v23_v13 }
  0x1d   :  { %274 = vmatpush.msra.mxu2 %v23_v13  ;;  %275 = vmatpush.msra.mxu3 %v23_v13 }
  0x1e   :  { %76 = vmatpush.msra.mxu0 %v22_v14  ;;  %276 = vmatpush.msra.mxu1 %v22_v14 }
  0x1f   :  { %277 = vmatpush.msra.mxu2 %v22_v14  ;;  %278 = vmatpush.msra.mxu3 %v22_v14 }
  0x20   :  { %77 = vmatpush.msra.mxu0 %v21_v15  ;;  %279 = vmatpush.msra.mxu1 %v21_v15 }
  0x21   :  { %78 = vmatmul.f32.vlgmr.msra.gmra.mxu0 %v43_v16  ;;  %90 = vmatmul.f32.vlgmr.msra.gmra.mxu1 %v47_v17 }
  0x22   :  { %280 = vmatpush.msra.mxu2 %v21_v15  ;;  %281 = vmatpush.msra.mxu3 %v21_v15 }
  0x23   :  { %102 = vmatmul.f32.vlgmr.msra.gmra.mxu2 %v51_v18  ;;  %114 = vmatmul.f32.vlgmr.msra.gmra.mxu3 %v55_v19 }
  0x24   :  { %177 = vperm.xlu1 %283, %v38_v43   ;;  %187 = vperm.xlu2 %284, %v40_v60  }
  0x29   :  { %81 = vmatmul.f32.gmra.mxu0 %v44_v20  ;;  %93 = vmatmul.f32.gmra.mxu1 %v48_v21 }
  0x2b   :  { %105 = vmatmul.f32.gmra.mxu2 %v52_v22  ;;  %117 = vmatmul.f32.gmra.mxu3 %v56_v23 }
  0x2c   :  { %182 = vperm.xlu1 %283, %v39_v49   ;;  %192 = vperm.xlu2 %284, %v41_v63  }
  0x31   :  { %84 = vmatmul.f32.gmra.mxu0 %v45_v24  ;;  %96 = vmatmul.f32.gmra.mxu1 %v49_v25 }
  0x33   :  { %108 = vmatmul.f32.gmra.mxu2 %v53_v26  ;;  %120 = vmatmul.f32.gmra.mxu3 %v57_v27 }
  0x39   :  { %87 = vmatmul.f32.gmra.mxu0 %v46_v28  ;;  %99 = vmatmul.f32.gmra.mxu1 %v50_v29 }
  0x3b   :  { %111 = vmatmul.f32.gmra.mxu2 %v54_v30  ;;  %123 = vmatmul.f32.gmra.mxu3 %v58_v31 }
  0x7e   :  { %v188_v25 = vpop.permute.xlu2 %187 }
  0x96   :  { %v178_v23 = vpop.permute.xlu1 %177 }
  0x9e   :  { %v79_v33 = vpop.f32.mrf.mxu0  ;;  %v91_v42 = vpop.f32.mrf.mxu1 }
  0x9f   :  { %v80_v34 = vadd.f32 %v421_v32, %v79_v33  ;;  %v92_v48 = vadd.f32 %v421_v32, %v91_v42  ;;  %v183_v26 = vpop.permute.xlu1 %182  ;;  %v193_v33 = vpop.permute.xlu2 %192  ;;  %v208_v42 = vstv %s464_s4 }
  0xa1   :  { %v127_v35 = vmax.f32 %v80_v34, 0.0  ;;  %v131_v51 = vmax.f32 %v92_v48, 0.0 }
  0xa3   :  { %143 = vxpose.xlu0.b32.start [1/16] (narrow) %v127_v35, 32 }
  0xa6   :  { %v82_v36 = vpop.f32.mrf.mxu0  ;;  %v94_v50 = vpop.f32.mrf.mxu1 }
  0xa7   :  { %v83_v37 = vadd.f32 %v421_v32, %v82_v36  ;;  %v95_v52 = vadd.f32 %v421_v32, %v94_v50  ;;  %v103_v58 = vpop.f32.mrf.mxu2  ;;  %v115_v8 = vpop.f32.mrf.mxu3 }
  0xa8   :  { %v104_v62 = vadd.f32 %v421_v32, %v103_v58  ;;  %v116_v11 = vadd.f32 %v421_v32, %v115_v8 }
  0xa9   :  { %v128_v38 = vmax.f32 %v83_v37, 0.0  ;;  %v132_v54 = vmax.f32 %v95_v52, 0.0 }
  0xaa   :  { %v135_v1 = vmax.f32 %v104_v62, 0.0  ;;  %v139_v13 = vmax.f32 %v116_v11, 0.0 }
  0xab   :  { %144 = vxpose.xlu0.b32.cont [2/16] (narrow) %v128_v38, 32 }
  0xae   :  { %v85_v39 = vpop.f32.mrf.mxu0  ;;  %v97_v53 = vpop.f32.mrf.mxu1 }
  0xaf   :  { %v86_v40 = vadd.f32 %v421_v32, %v85_v39  ;;  %v98_v55 = vadd.f32 %v421_v32, %v97_v53  ;;  %v106_v0 = vpop.f32.mrf.mxu2  ;;  %v118_v12 = vpop.f32.mrf.mxu3 }
  0xb0   :  { %v107_v2 = vadd.f32 %v421_v32, %v106_v0  ;;  %v119_v14 = vadd.f32 %v421_v32, %v118_v12 }
  0xb1   :  { %v129_v41 = vmax.f32 %v86_v40, 0.0  ;;  %v133_v56 = vmax.f32 %v98_v55, 0.0 }
  0xb2   :  { %v136_v4 = vmax.f32 %v107_v2, 0.0  ;;  %v140_v16 = vmax.f32 %v119_v14, 0.0 }
  0xb3   :  { %145 = vxpose.xlu0.b32.cont [3/16] (narrow) %v129_v41, 32 }
  0xb6   :  { %v88_v45 = vpop.f32.mrf.mxu0  ;;  %v100_v57 = vpop.f32.mrf.mxu1 }
  0xb7   :  { %v89_v46 = vadd.f32 %v421_v32, %v88_v45  ;;  %v101_v59 = vadd.f32 %v421_v32, %v100_v57  ;;  %v109_v3 = vpop.f32.mrf.mxu2  ;;  %v121_v15 = vpop.f32.mrf.mxu3 }
  0xb8   :  { %v110_v5 = vadd.f32 %v421_v32, %v109_v3  ;;  %v122_v17 = vadd.f32 %v421_v32, %v121_v15 }
  0xb9   :  { %v130_v47 = vmax.f32 %v89_v46, 0.0  ;;  %v134_v61 = vmax.f32 %v101_v59, 0.0 }
  0xba   :  { %v137_v6 = vmax.f32 %v110_v5, 0.0  ;;  %v141_v18 = vmax.f32 %v122_v17, 0.0 }
  0xbb   :  { %146 = vxpose.xlu0.b32.cont [4/16] (narrow) %v130_v47, 32 }
  0xbf   :  { %v112_v7 = vpop.f32.mrf.mxu2  ;;  %v124_v19 = vpop.f32.mrf.mxu3 }
  0xc0   :  { %v113_v9 = vadd.f32 %v421_v32, %v112_v7  ;;  %v125_v20 = vadd.f32 %v421_v32, %v124_v19 }
  0xc2   :  { %v138_v10 = vmax.f32 %v113_v9, 0.0  ;;  %v142_v21 = vmax.f32 %v125_v20, 0.0 }
  0xc3   :  { %147 = vxpose.xlu0.b32.cont [5/16] (narrow) %v131_v51, 32 }
  0xcb   :  { %148 = vxpose.xlu0.b32.cont [6/16] (narrow) %v132_v54, 32 }
  0xd3   :  { %149 = vxpose.xlu0.b32.cont [7/16] (narrow) %v133_v56, 32 }
  0xdb   :  { %150 = vxpose.xlu0.b32.cont [8/16] (narrow) %v134_v61, 32 }
  0xe3   :  { %151 = vxpose.xlu0.b32.cont [9/16] (narrow) %v135_v1, 32 }
  0xeb   :  { %152 = vxpose.xlu0.b32.cont [10/16] (narrow) %v136_v4, 32 }
  0xf3   :  { %153 = vxpose.xlu0.b32.cont [11/16] (narrow) %v137_v6, 32 }
  0xfb   :  { %154 = vxpose.xlu0.b32.cont [12/16] (narrow) %v138_v10, 32 }
 0x103   :  { %155 = vxpose.xlu0.b32.cont [13/16] (narrow) %v139_v13, 32 }
 0x10b   :  { %156 = vxpose.xlu0.b32.cont [14/16] (narrow) %v140_v16, 32 }
 0x113   :  { %157 = vxpose.xlu0.b32.cont [15/16] (narrow) %v141_v18, 32 }
 0x11b   :  { %158 = vxpose.xlu0.b32.end [16/16] (narrow) %v142_v21, 32 }
 0x147   :  { %v159_v22 = vpop.trf.xlu0 }
 0x148   :  { %v195_v29 = vmul.f32 %v178_v23, %v159_v22 }
 0x14f   :  { %v160_v24 = vpop.trf.xlu0 }
 0x150   :  { %v196_v28 = vmul.f32 %v183_v26, %v160_v24 }
 0x152   :  { %v199_v31 = vadd.f32 %v196_v28, %v195_v29 }
 0x157   :  { %v161_v27 = vpop.trf.xlu0 }
 0x158   :  { %v197_v30 = vmul.f32 %v188_v25, %v161_v27 }
 0x15a   :  { %v200_v35 = vadd.f32 %v199_v31, %v197_v30 }
 0x15f   :  { %v162_v34 = vpop.trf.xlu0 }
 0x160   :  { %v198_v36 = vmul.f32 %v193_v33, %v162_v34 }
 0x162   :  { %v201_v37 = vadd.f32 %v200_v35, %v198_v36 }
 0x164   :  { %v202_v38 = vrot.slane %v201_v37, 4 }
 0x166   :  { %v203_v39 = vadd.f32 %v202_v38, %v201_v37 }
 0x168   :  { %v204_v32 = vrot.slane %v203_v39, 2 }
 0x16a   :  { %v205_v40 = vadd.f32 %v204_v32, %v203_v39 }
 0x16c   :  { %v206_v41 = vrot.slane %v205_v40, 1 }
 0x16e   :  { %v207_v43 = vadd.f32 %v206_v41, %v205_v40 }
 0x170   :  { %v209_v45 = vadd.f32 %v208_v42, %v207_v43 }
 0x172   :  { %v210_v46 = vsub.f32 0.0, %v209_v45 }
 0x174   :  { %v211_v47 = vmul.f32 1.442695, %v210_v46 }
 0x176   :  { %287 = vpow2.f32 %v211_v47 }
 0x17c   :  { %v288_v48 = vpop.eup %287 }
 0x17d   :  { %v213_v49 = vadd.f32 1.0, %v288_v48 }
 0x17f   :  { %289 = vrcp.f32 %v213_v49  ;;  %v225_v53 = vand.u32 2147483648, %v213_v49  ;;  %v223_v55 = vand.u32 2147483647, %v213_v49  ;;  %vm219_vm1 = vweird.f32 %v213_v49 }
 0x181   :  { %v226_v57 = vor.u32 1.1754944e-38, %v225_v53  ;;  %vm224_vm3 = vcmp.eq.f32.partialorder %v223_v55, 8.507059e+37 }
 0x182   :  { %285 = vset.pattern.permute.xlu0 %v291_v44 }
 0x185   :  { %v290_v50 = vpop.eup %289 }
 0x186   :  { %v215_v51 = vmul.f32 %v290_v50, %v213_v49  ;;  %vm220_vm0 = vweird.f32 %v290_v50 }
 0x187   :  { %vm221_vm2 = vmor %vm219_vm1, %vm220_vm0 }
 0x188   :  { %v216_v52 = vsub.f32 1.0, %v215_v51 }
 0x18a   :  { %v217_v54 = vmul.f32 %v290_v50, %v216_v52 }
 0x18c   :  { %v218_v56 = vadd.f32 %v290_v50, %v217_v54 }
 0x18e   :  { %v222_v58 = vsel %vm221_vm2, %v290_v50, %v218_v56 }
 0x18f   :  { %v227_v59 = vsel %vm224_vm3, %v226_v57, %v222_v58 }
 0x190   :  { %229 = vst [vmem:[%s465_s5] sm:$0x1] %v227_v59 }

</bundles_post_ra>
